<compile_context>
chip_gen: v6e
topology: v6e:2x2x1
jax: 0.10.0
libtpu: 0.0.40
codegen_flags: <defaults>
</compile_context>

<pallas_src>
import functools
import math

import jax
import jax.numpy as jnp
import numpy as np
from jax.experimental import pallas as pl
from jax.experimental.pallas import tpu as pltpu

_LANE = 128


def _round_up(x, m):
    return ((x + m - 1) // m) * m


def _pad_to(a, shape):
    pads = [(0, t - s) for s, t in zip(a.shape, shape)]
    if not any(p for _, p in pads):
        return a
    return jnp.pad(a, pads)


def _pick_tile(n, candidates):
    for c in candidates:
        if c <= n and n % c == 0:
            return c
    return n


# --------------------------------------------------------------------------- #
# Path A: small-N fused kernel — both layers, adjacency read once per batch.  #
# --------------------------------------------------------------------------- #
def _fused_gcn_kernel(adj_ref, x_ref, w1_ref, b1_ref, w2_ref, b2_ref, out_ref):
    """adj:(Bb,N,N) x:(Bb,N,Din) w1:(Din,Hp) b1:(1,Hp) w2:(Hp,Dp) b2:(1,Dp) out:(Bb,N,Dp)."""
    cdt = adj_ref.dtype  # MXU operand dtype (bf16 default, f32 for strict parity)
    bb = adj_ref.shape[0]
    # Static unroll over the (small) batch block: plain 2-D MXU dots (no batched
    # dot_general), amortizing per-grid-step pipeline overhead over Bb batches.
    for ib in range(bb):
        adj = adj_ref[ib]
        # layer 1: h = relu(A @ (X @ W1) + b1)     (f32 accumulation, f32 bias/relu)
        s1 = jnp.dot(x_ref[ib], w1_ref[...], preferred_element_type=jnp.float32)
        h = jnp.dot(adj, s1.astype(cdt), preferred_element_type=jnp.float32)
        h = jnp.maximum(h + b1_ref[...], 0.0)
        # layer 2: logits = A @ (h @ W2) + b2      (module's operand order)
        s2 = jnp.dot(h.astype(cdt), w2_ref[...], preferred_element_type=jnp.float32)
        out = jnp.dot(adj, s2.astype(cdt), preferred_element_type=jnp.float32)
        out_ref[ib] = (out + b2_ref[...]).astype(out_ref.dtype)


def _forward_fused(adj_c, x_c, w1p, b1p, w2p, b2p, *, max_batch_block=8):
    B, N, Din = x_c.shape
    Hp = w1p.shape[1]
    Dp = w2p.shape[1]
    itemsize = jnp.dtype(adj_c.dtype).itemsize
    # Largest divisor of B (capped) whose adjacency block stays small in VMEM
    # (blocks are double-buffered by the pipeline).
    bb = 1
    for cand in range(1, min(B, max_batch_block) + 1):
        if B % cand == 0 and cand * N * N * itemsize <= (4 << 20):
            bb = cand
    return pl.pallas_call(
        _fused_gcn_kernel,
        out_shape=jax.ShapeDtypeStruct((B, N, Dp), jnp.float32),
        grid_spec=pltpu.PrefetchScalarGridSpec(
            num_scalar_prefetch=0,
            grid=(B // bb,),
            in_specs=[
                pl.BlockSpec((bb, N, N), lambda g: (g, 0, 0)),      # adjacency block
                pl.BlockSpec((bb, N, Din), lambda g: (g, 0, 0)),    # feature block
                pl.BlockSpec((Din, Hp), lambda g: (0, 0)),          # W1 (resident)
                pl.BlockSpec((1, Hp), lambda g: (0, 0)),            # b1 (resident, f32)
                pl.BlockSpec((Hp, Dp), lambda g: (0, 0)),           # W2 (resident)
                pl.BlockSpec((1, Dp), lambda g: (0, 0)),            # b2 (resident, f32)
            ],
            out_specs=pl.BlockSpec((bb, N, Dp), lambda g: (g, 0, 0)),
        ),
        compiler_params=pltpu.CompilerParams(
            dimension_semantics=("parallel",),     # shard batch across TCs (v7x)
            vmem_limit_bytes=32 * 1024 * 1024,     # raise v5e's 16 MiB default
        ),
    )(adj_c, x_c, w1p, b1p, w2p, b2p)


# --------------------------------------------------------------------------- #
# Path B: large-N — one tiled pallas_call per GraphConvolution layer.         #
# --------------------------------------------------------------------------- #
def _gcn_layer_tiled_kernel(adj_ref, x_ref, w_ref, b_ref, out_ref, acc_ref, *, relu):
    """One layer: out = [relu](A @ (X @ W) + b), adjacency tiled (tm, tk), k last."""
    k = pl.program_id(2)

    @pl.when(k == 0)
    def _():
        acc_ref[...] = jnp.zeros_like(acc_ref)

    # support rows for this k-tile: (tk, Din) @ (Din, Hout) — negligible vs the
    # adjacency tile DMA even though it is recomputed per row-tile.
    support = jnp.dot(x_ref[...], w_ref[...], preferred_element_type=jnp.float32)
    acc_ref[...] += jnp.dot(adj_ref[...], support.astype(adj_ref.dtype),
                            preferred_element_type=jnp.float32)

    @pl.when(k == pl.num_programs(2) - 1)
    def _():
        out = acc_ref[...] + b_ref[...]
        if relu:
            out = jnp.maximum(out, 0.0)
        out_ref[...] = out.astype(out_ref.dtype)


def _gcn_layer_tiled(adj, x, w_p, b_p, *, relu, out_dtype):
    B, N, _ = adj.shape
    Din = x.shape[-1]
    Hout = w_p.shape[1]
    tm = _pick_tile(N, (256, 128))          # output-row tile
    tk = _pick_tile(N, (512, 256, 128))     # lane-dim tile of the adjacency (>=128)
    # TODO(synk): sweep pipeline_mode=pl.Buffered(3) on the adjacency spec once the
    # per-tile DMA is the exposed latency (keep tiles inside v7x's 64 MiB VMEM).
    kernel = functools.partial(_gcn_layer_tiled_kernel, relu=relu)
    return pl.pallas_call(
        kernel,
        out_shape=jax.ShapeDtypeStruct((B, N, Hout), out_dtype),
        grid_spec=pltpu.PrefetchScalarGridSpec(
            num_scalar_prefetch=0,
            grid=(B, N // tm, N // tk),                                # reduction last
            in_specs=[
                pl.BlockSpec((None, tm, tk), lambda b, i, k: (b, i, k)),   # A tile
                pl.BlockSpec((None, tk, Din), lambda b, i, k: (b, k, 0)),  # X rows (k-tile)
                pl.BlockSpec((Din, Hout), lambda b, i, k: (0, 0)),         # W (resident)
                pl.BlockSpec((1, Hout), lambda b, i, k: (0, 0)),           # bias (f32)
            ],
            out_specs=pl.BlockSpec((None, tm, Hout), lambda b, i, k: (b, i, 0)),
            scratch_shapes=[pltpu.VMEM((tm, Hout), jnp.float32)],          # f32 acc
        ),
        compiler_params=pltpu.CompilerParams(
            dimension_semantics=("parallel", "parallel", "arbitrary"),
            vmem_limit_bytes=32 * 1024 * 1024,
        ),
    )(adj, x, w_p, b_p)


# --------------------------------------------------------------------------- #
# Wrapper matching GcnNet.forward(feature, left, adjacency).                  #
# --------------------------------------------------------------------------- #
def gcn_net_forward(params, feature, left, adjacency, *, mxu_dtype=jnp.bfloat16):
    """GcnNet.forward.  `left` is unused by the module's forward (kept for parity).

    mxu_dtype: dtype of the MXU operands (adjacency / X / W / intermediates).
      Default bfloat16 halves the HBM bytes of the dominant B*N*N adjacency on all
      generations (f32 accumulation throughout).  Use jnp.float32 for strict parity
      with the f32 PyTorch module.
      # TODO(synk): on v7x an fp8 adjacency (NOT int8 — v7x MXU has no int path)
      # would quarter the adjacency bytes; omitted to keep one portable path.
    """
    del left  # unused by the PyTorch forward
    (w1, b1), (w2, b2) = params
    B, N, Din = feature.shape
    H = w1.shape[1]
    Dout = w2.shape[1]
    assert adjacency.shape == (B, N, N)
    assert w1.shape == (Din, H) and w2.shape == (H, Dout)

    # Lane-dense zero padding: H -> Hp and Dout -> Dp (multiples of 128). Exact:
    # zero W1 columns give h[:, H:] = relu(0) = 0 and the matching zero W2 rows
    # contribute nothing; padding is sliced off on return.
    Hp = _round_up(H, _LANE)
    Dp = _round_up(Dout, _LANE)
    w1p = _pad_to(w1, (Din, Hp)).astype(mxu_dtype)
    b1p = _pad_to(b1.reshape(1, H), (1, Hp)).astype(jnp.float32)
    w2p = _pad_to(w2, (Hp, Dp)).astype(mxu_dtype)
    b2p = _pad_to(b2.reshape(1, Dout), (1, Dp)).astype(jnp.float32)

    adj_c = adjacency.astype(mxu_dtype)
    x_c = feature.astype(mxu_dtype)

    if N % _LANE == 0 and N > _LANE:
        # Large-N: per-layer tiled calls (h is only N*Hp bytes; each layer re-reads
        # A anyway, and each call picks its own tiles — matters under v7x's 64 MiB).
        h = _gcn_layer_tiled(adj_c, x_c, w1p, b1p, relu=True, out_dtype=mxu_dtype)
        out_padded = _gcn_layer_tiled(adj_c, h, w2p, b2p, relu=False,
                                      out_dtype=jnp.float32)
    else:
        # Small-N: single fused call, adjacency read from HBM once, Bb batches/step.
        # TODO(synk): for large N not divisible by 128, zero-pad N to 128 and use
        # the tiled path instead of this whole-(N,N)-block fallback.
        out_padded = _forward_fused(adj_c, x_c, w1p, b1p, w2p, b2p)

    # NOTE: if the consumer accepts the (..., Dp) padded logits, return out_padded
    # directly and skip this copy.
    return out_padded[..., :Dout]


# --------------------------------------------------------------------------- #
# Init + reference + self-test.                                               #
# --------------------------------------------------------------------------- #
def init_gcn_params(key, input_dim, output_dim):
    """kaiming_uniform_-style init matching the PyTorch parameter shapes."""
    fan_in = output_dim  # torch fan_in of a (input_dim, output_dim) tensor is size(1)
    bound = math.sqrt(6.0 / fan_in)
    w = jax.random.uniform(key, (input_dim, output_dim), jnp.float32, -bound, bound)
    b = jnp.zeros((output_dim,), jnp.float32)
    return w, b


def gcn_net_reference(params, feature, adjacency):
    """float64 NumPy reference (independent of TPU matmul precision)."""
    (w1, b1), (w2, b2) = params
    a = np.asarray(adjacency, np.float64)
    x = np.asarray(feature, np.float64)
    w1 = np.asarray(w1, np.float64)
    b1 = np.asarray(b1, np.float64)
    w2 = np.asarray(w2, np.float64)
    b2 = np.asarray(b2, np.float64)
    h = np.maximum(a @ (x @ w1) + b1, 0.0)
    return a @ (h @ w2) + b2


def _rel_err(out, ref):
    out = np.asarray(out, np.float64)
    return float(np.max(np.abs(out - ref)) / (np.max(np.abs(ref)) + 1e-12))


if __name__ == "__main__":
    key = jax.random.PRNGKey(0)
    k_f1, k_a1, k_w1, k_w2, k_f2, k_a2 = jax.random.split(key, 6)

    INPUT_DIM, HIDDEN = 32, 16
    params = (
        init_gcn_params(k_w1, INPUT_DIM, HIDDEN),   # gcn1: 32 -> 16
        init_gcn_params(k_w2, HIDDEN, INPUT_DIM),   # gcn2: 16 -> 32
    )

    # ---- small-N regime: fused single-call path ------------------------------
    B, N = 2, 16
    feature = jax.random.normal(k_f1, (B, N, INPUT_DIM), dtype=jnp.float32)
    adjacency = jax.random.uniform(k_a1, (B, N, N), dtype=jnp.float32) / N
    left = jnp.zeros((B,), jnp.float32)   # unused by forward; kept for parity
    ref = gcn_net_reference(params, feature, adjacency)

    out_f32 = jax.block_until_ready(
        gcn_net_forward(params, feature, left, adjacency, mxu_dtype=jnp.float32))
    assert out_f32.shape == (B, N, INPUT_DIM)
    assert _rel_err(out_f32, ref) < 1e-3, _rel_err(out_f32, ref)

    out_bf16 = jax.block_until_ready(
        gcn_net_forward(params, feature, left, adjacency))    # default bf16 MXU path
    assert _rel_err(out_bf16, ref) < 3e-2, _rel_err(out_bf16, ref)

    # ---- larger-N regime: tiled per-layer path --------------------------------
    B2, N2 = 2, 1024
    feature2 = jax.random.normal(k_f2, (B2, N2, INPUT_DIM), dtype=jnp.float32)
    adjacency2 = jax.random.uniform(k_a2, (B2, N2, N2), dtype=jnp.float32) / N2
    left2 = jnp.zeros((B2,), jnp.float32)
    ref2 = gcn_net_reference(params, feature2, adjacency2)

    out2_f32 = jax.block_until_ready(
        gcn_net_forward(params, feature2, left2, adjacency2, mxu_dtype=jnp.float32))
    assert out2_f32.shape == (B2, N2, INPUT_DIM)
    assert _rel_err(out2_f32, ref2) < 1e-3, _rel_err(out2_f32, ref2)

    out2_bf16 = jax.block_until_ready(
        gcn_net_forward(params, feature2, left2, adjacency2))
    assert _rel_err(out2_bf16, ref2) < 3e-2, _rel_err(out2_bf16, ref2)

    print("KERNEL_OK")
</pallas_src>

<mosaic_0001>
module attributes {stable_mosaic.version = 11 : i64} {
  func.func @_fused_gcn_kernel(%arg0: i32, %arg1: memref<2x16x16xf32, #tpu.memory_space<vmem>>, %arg2: memref<2x16x32xf32, #tpu.memory_space<vmem>>, %arg3: memref<32x128xf32, #tpu.memory_space<vmem>>, %arg4: memref<1x128xf32, #tpu.memory_space<vmem>>, %arg5: memref<128x128xf32, #tpu.memory_space<vmem>>, %arg6: memref<1x128xf32, #tpu.memory_space<vmem>>, %arg7: memref<2x16x128xf32, #tpu.memory_space<vmem>>) attributes {dimension_semantics = [#tpu.dimension_semantics<parallel>], iteration_bounds = array<i64: 1>, scalar_prefetch = 0 : i64, scratch_operands = 0 : i64, tpu.core_type = #tpu.core_type<tc>, window_params = [{transform_indices = @transform_0, window_bounds = array<i64: 2, 16, 16>}, {transform_indices = @transform_1, window_bounds = array<i64: 2, 16, 32>}, {pipeline_mode = #tpu.pipeline_mode<synchronous>, transform_indices = @transform_2, window_bounds = array<i64: 32, 128>}, {pipeline_mode = #tpu.pipeline_mode<synchronous>, transform_indices = @transform_3, window_bounds = array<i64: 1, 128>}, {pipeline_mode = #tpu.pipeline_mode<synchronous>, transform_indices = @transform_4, window_bounds = array<i64: 128, 128>}, {pipeline_mode = #tpu.pipeline_mode<synchronous>, transform_indices = @transform_5, window_bounds = array<i64: 1, 128>}, {transform_indices = @transform_6, window_bounds = array<i64: 2, 16, 128>}]} {
    %c0 = arith.constant 0 : index
    %c0_0 = arith.constant 0 : index
    %c0_1 = arith.constant 0 : index
    %0 = vector.load %arg1[%c0, %c0_0, %c0_1] : memref<2x16x16xf32, #tpu.memory_space<vmem>>, vector<1x16x16xf32>
    %1 = vector.shape_cast %0 : vector<1x16x16xf32> to vector<16x16xf32>
    %c0_2 = arith.constant 0 : index
    %c0_3 = arith.constant 0 : index
    %c0_4 = arith.constant 0 : index
    %2 = vector.load %arg2[%c0_2, %c0_3, %c0_4] : memref<2x16x32xf32, #tpu.memory_space<vmem>>, vector<1x16x32xf32>
    %3 = vector.shape_cast %2 : vector<1x16x32xf32> to vector<16x32xf32>
    %c0_5 = arith.constant 0 : index
    %c0_6 = arith.constant 0 : index
    %4 = vector.load %arg3[%c0_5, %c0_6] : memref<32x128xf32, #tpu.memory_space<vmem>>, vector<32x128xf32>
    %cst = arith.constant dense<0.000000e+00> : vector<16x128xf32>
    %5 = tpu.matmul %3, %4, %cst {dimension_numbers = #tpu.dot_dimension_numbers<[1], [0], [0], [1], [0, 0, 1, 1], [], []>} : vector<16x32xf32>, vector<32x128xf32>, vector<16x128xf32> -> vector<16x128xf32>
    %cst_7 = arith.constant dense<0.000000e+00> : vector<16x128xf32>
    %6 = tpu.matmul %1, %5, %cst_7 {dimension_numbers = #tpu.dot_dimension_numbers<[1], [0], [0], [1], [0, 0, 1, 1], [], []>} : vector<16x16xf32>, vector<16x128xf32>, vector<16x128xf32> -> vector<16x128xf32>
    %c0_8 = arith.constant 0 : index
    %c0_9 = arith.constant 0 : index
    %7 = vector.load %arg4[%c0_8, %c0_9] : memref<1x128xf32, #tpu.memory_space<vmem>>, vector<1x128xf32>
    %8 = vector.broadcast %7 : vector<1x128xf32> to vector<16x128xf32>
    %9 = arith.addf %6, %8 : vector<16x128xf32>
    %cst_10 = arith.constant 0.000000e+00 : f32
    %10 = vector.broadcast %cst_10 : f32 to vector<16x128xf32>
    %11 = arith.maximumf %9, %10 : vector<16x128xf32>
    %c0_11 = arith.constant 0 : index
    %c0_12 = arith.constant 0 : index
    %12 = vector.load %arg5[%c0_11, %c0_12] : memref<128x128xf32, #tpu.memory_space<vmem>>, vector<128x128xf32>
    %cst_13 = arith.constant dense<0.000000e+00> : vector<16x128xf32>
    %13 = tpu.matmul %11, %12, %cst_13 {dimension_numbers = #tpu.dot_dimension_numbers<[1], [0], [0], [1], [0, 0, 1, 1], [], []>} : vector<16x128xf32>, vector<128x128xf32>, vector<16x128xf32> -> vector<16x128xf32>
    %cst_14 = arith.constant dense<0.000000e+00> : vector<16x128xf32>
    %14 = tpu.matmul %1, %13, %cst_14 {dimension_numbers = #tpu.dot_dimension_numbers<[1], [0], [0], [1], [0, 0, 1, 1], [], []>} : vector<16x16xf32>, vector<16x128xf32>, vector<16x128xf32> -> vector<16x128xf32>
    %c0_15 = arith.constant 0 : index
    %c0_16 = arith.constant 0 : index
    %15 = vector.load %arg6[%c0_15, %c0_16] : memref<1x128xf32, #tpu.memory_space<vmem>>, vector<1x128xf32>
    %16 = vector.broadcast %15 : vector<1x128xf32> to vector<16x128xf32>
    %17 = arith.addf %14, %16 : vector<16x128xf32>
    %c0_17 = arith.constant 0 : index
    %c0_18 = arith.constant 0 : index
    %c0_19 = arith.constant 0 : index
    %18 = vector.load %arg7[%c0_17, %c0_18, %c0_19] : memref<2x16x128xf32, #tpu.memory_space<vmem>>, vector<1x16x128xf32>
    %19 = vector.shape_cast %18 : vector<1x16x128xf32> to vector<16x128xf32>
    %20 = vector.shape_cast %17 : vector<16x128xf32> to vector<1x16x128xf32>
    tpu.vector_store %arg7[%c0_17, %c0_18, %c0_19], %20 {strides = array<i32>} : memref<2x16x128xf32, #tpu.memory_space<vmem>>, vector<1x16x128xf32>,
    %c1 = arith.constant 1 : index
    %c0_20 = arith.constant 0 : index
    %c0_21 = arith.constant 0 : index
    %21 = vector.load %arg1[%c1, %c0_20, %c0_21] : memref<2x16x16xf32, #tpu.memory_space<vmem>>, vector<1x16x16xf32>
    %22 = vector.shape_cast %21 : vector<1x16x16xf32> to vector<16x16xf32>
    %c1_22 = arith.constant 1 : index
    %c0_23 = arith.constant 0 : index
    %c0_24 = arith.constant 0 : index
    %23 = vector.load %arg2[%c1_22, %c0_23, %c0_24] : memref<2x16x32xf32, #tpu.memory_space<vmem>>, vector<1x16x32xf32>
    %24 = vector.shape_cast %23 : vector<1x16x32xf32> to vector<16x32xf32>
    %c0_25 = arith.constant 0 : index
    %c0_26 = arith.constant 0 : index
    %25 = vector.load %arg3[%c0_25, %c0_26] : memref<32x128xf32, #tpu.memory_space<vmem>>, vector<32x128xf32>
    %cst_27 = arith.constant dense<0.000000e+00> : vector<16x128xf32>
    %26 = tpu.matmul %24, %25, %cst_27 {dimension_numbers = #tpu.dot_dimension_numbers<[1], [0], [0], [1], [0, 0, 1, 1], [], []>} : vector<16x32xf32>, vector<32x128xf32>, vector<16x128xf32> -> vector<16x128xf32>
    %cst_28 = arith.constant dense<0.000000e+00> : vector<16x128xf32>
    %27 = tpu.matmul %22, %26, %cst_28 {dimension_numbers = #tpu.dot_dimension_numbers<[1], [0], [0], [1], [0, 0, 1, 1], [], []>} : vector<16x16xf32>, vector<16x128xf32>, vector<16x128xf32> -> vector<16x128xf32>
    %c0_29 = arith.constant 0 : index
    %c0_30 = arith.constant 0 : index
    %28 = vector.load %arg4[%c0_29, %c0_30] : memref<1x128xf32, #tpu.memory_space<vmem>>, vector<1x128xf32>
    %29 = vector.broadcast %28 : vector<1x128xf32> to vector<16x128xf32>
    %30 = arith.addf %27, %29 : vector<16x128xf32>
    %cst_31 = arith.constant 0.000000e+00 : f32
    %31 = vector.broadcast %cst_31 : f32 to vector<16x128xf32>
    %32 = arith.maximumf %30, %31 : vector<16x128xf32>
    %c0_32 = arith.constant 0 : index
    %c0_33 = arith.constant 0 : index
    %33 = vector.load %arg5[%c0_32, %c0_33] : memref<128x128xf32, #tpu.memory_space<vmem>>, vector<128x128xf32>
    %cst_34 = arith.constant dense<0.000000e+00> : vector<16x128xf32>
    %34 = tpu.matmul %32, %33, %cst_34 {dimension_numbers = #tpu.dot_dimension_numbers<[1], [0], [0], [1], [0, 0, 1, 1], [], []>} : vector<16x128xf32>, vector<128x128xf32>, vector<16x128xf32> -> vector<16x128xf32>
    %cst_35 = arith.constant dense<0.000000e+00> : vector<16x128xf32>
    %35 = tpu.matmul %22, %34, %cst_35 {dimension_numbers = #tpu.dot_dimension_numbers<[1], [0], [0], [1], [0, 0, 1, 1], [], []>} : vector<16x16xf32>, vector<16x128xf32>, vector<16x128xf32> -> vector<16x128xf32>
    %c0_36 = arith.constant 0 : index
    %c0_37 = arith.constant 0 : index
    %36 = vector.load %arg6[%c0_36, %c0_37] : memref<1x128xf32, #tpu.memory_space<vmem>>, vector<1x128xf32>
    %37 = vector.broadcast %36 : vector<1x128xf32> to vector<16x128xf32>
    %38 = arith.addf %35, %37 : vector<16x128xf32>
    %c1_38 = arith.constant 1 : index
    %c0_39 = arith.constant 0 : index
    %c0_40 = arith.constant 0 : index
    %39 = vector.load %arg7[%c1_38, %c0_39, %c0_40] : memref<2x16x128xf32, #tpu.memory_space<vmem>>, vector<1x16x128xf32>
    %40 = vector.shape_cast %39 : vector<1x16x128xf32> to vector<16x128xf32>
    %41 = vector.shape_cast %38 : vector<16x128xf32> to vector<1x16x128xf32>
    tpu.vector_store %arg7[%c1_38, %c0_39, %c0_40], %41 {strides = array<i32>} : memref<2x16x128xf32, #tpu.memory_space<vmem>>, vector<1x16x128xf32>,
    return
  }
  func.func @transform_0(%arg0: i32) -> (i32, i32, i32) {
    %c0_i32 = arith.constant 0 : i32
    %c0_i32_0 = arith.constant 0 : i32
    %c0_i32_1 = arith.constant 0 : i32
    return %arg0, %c0_i32, %c0_i32_0 : i32, i32, i32
  }
  func.func @transform_1(%arg0: i32) -> (i32, i32, i32) {
    %c0_i32 = arith.constant 0 : i32
    %c0_i32_0 = arith.constant 0 : i32
    %c0_i32_1 = arith.constant 0 : i32
    return %arg0, %c0_i32, %c0_i32_0 : i32, i32, i32
  }
  func.func @transform_2(%arg0: i32) -> (i32, i32) {
    %c0_i32 = arith.constant 0 : i32
    %c0_i32_0 = arith.constant 0 : i32
    %c0_i32_1 = arith.constant 0 : i32
    return %c0_i32, %c0_i32_0 : i32, i32
  }
  func.func @transform_3(%arg0: i32) -> (i32, i32) {
    %c0_i32 = arith.constant 0 : i32
    %c0_i32_0 = arith.constant 0 : i32
    %c0_i32_1 = arith.constant 0 : i32
    return %c0_i32, %c0_i32_0 : i32, i32
  }
  func.func @transform_4(%arg0: i32) -> (i32, i32) {
    %c0_i32 = arith.constant 0 : i32
    %c0_i32_0 = arith.constant 0 : i32
    %c0_i32_1 = arith.constant 0 : i32
    return %c0_i32, %c0_i32_0 : i32, i32
  }
  func.func @transform_5(%arg0: i32) -> (i32, i32) {
    %c0_i32 = arith.constant 0 : i32
    %c0_i32_0 = arith.constant 0 : i32
    %c0_i32_1 = arith.constant 0 : i32
    return %c0_i32, %c0_i32_0 : i32, i32
  }
  func.func @transform_6(%arg0: i32) -> (i32, i32, i32) {
    %c0_i32 = arith.constant 0 : i32
    %c0_i32_0 = arith.constant 0 : i32
    %c0_i32_1 = arith.constant 0 : i32
    return %arg0, %c0_i32, %c0_i32_0 : i32, i32, i32
  }
}

</mosaic_0001>

<bundles_post_ra>
// kernel: tpu_custom_call.1
= control target key start
LH: loop header
LB: loop body
LE: loop exit
PB: predicated region body
PF: predicated region fallthrough
CT: control target
= control target key end

     0   :  { %11 = vsyncpa [#allocation3], 0  ;;  %s1352_s0 = inlined_call_operand.hbm [shape: f32[2,16,16], index: 0, kind: input, shape index: {}]   ;;  %s1353_s1 = inlined_call_operand.hbm [shape: f32[2,16,32], index: 1, kind: input, shape index: {}]   ;;  %s1354_s2 = inlined_call_operand.hbm [shape: f32[32,128], index: 2, kind: input, shape index: {}]   ;;  %s1355_s3 = inlined_call_operand.vmem [shape: f32[1,128], index: 3, kind: input, shape index: {}]   ;;  %s1356_s4 = inlined_call_operand.hbm [shape: f32[128,128], index: 4, kind: input, shape index: {}]   ;;  %s1357_s5 = inlined_call_operand.vmem [shape: f32[1,128], index: 5, kind: input, shape index: {}]   ;;  %s1358_s6 = inlined_call_operand.hbm [shape: f32[2,16,128], index: 6, kind: output, shape index: {}]  }
   0x1   :  { %12 = vsyncpa [#allocation6], 0 }
   0x2   :  { %13 = vsyncpa [#allocation9], 0 }
   0x3   :  { %14 = vsyncpa [#allocation4], 0  ;;  %s1126_s21 = smov [#allocation5]   ;;  %s1127_s23 = smov [#allocation2]  }
   0x4   :  { %s32_s22 = sshll.u32 %s1126_s21, 4  ;;  %s20_s24 = sshll.u32 %s1127_s23, 4  ;;  %s33_s22 = int_to_ptr.vmem [resolvable:$true] %s32_s22  ;;  %s21_s24 = int_to_ptr.vmem [resolvable:$true] %s20_s24 }
   0x5   :  { %s1026_s25 = scalar_lea.vmem %s33_s22, 512  ;;  %p1031_p1 = scmp.lt.s32.totalorder %s33_s22, %s33_s22 }
   0x6   :  { %p1027_p0 = scmp.ne.s32.totalorder %s33_s22, %s1026_s25  ;;  %p1032_p2 = scmp.lt.s32.totalorder %s1026_s25, %s1026_s25 }
   0x8   :  { %p1033_p3 = por %p1032_p2, %p1031_p1 }
   0xa   :  { %p1034_p4 = pnand %p1033_p3, %p1027_p0 }
   0xc   :  { %1037 = shalt.err (!%p1034_p4)
}
   0xd   :  { %s1128_s26 = smov 128   ;;  %s1129_s27 = smov 8  }
   0xe   :  { %38 = dma.hbm_to_vmem [thread:$0]  %s1353_s1, 512, %s33_s22, [#allocation6], %s1128_s26, %s1128_s26, %s1129_s27  }
   0xf   :  { %s1046_s30 = scalar_lea.vmem %s21_s24, 512  ;;  %p1051_p6 = scmp.lt.s32.totalorder %s21_s24, %s21_s24 }
  0x10   :  { %p1047_p5 = scmp.ne.s32.totalorder %s21_s24, %s1046_s30  ;;  %p1052_p7 = scmp.lt.s32.totalorder %s1046_s30, %s1046_s30 }
  0x12   :  { %p1053_p8 = por %p1052_p7, %p1051_p6 }
  0x14   :  { %p1054_p9 = pnand %p1053_p8, %p1047_p5 }
  0x16   :  { %1057 = shalt.err (!%p1054_p9)
}
  0x17   :  { %26 = dma.hbm_to_vmem [thread:$0]  %s1352_s0, 512, %s21_s24, [#allocation3], %s1128_s26, %s1128_s26, %s1129_s27  }
  0x18   :  { %s1130_s9 = smov [#allocation7]   ;;  %s1131_s11 = smov [#allocation8]  }
  0x19   :  { %s44_s10 = sshll.u32 %s1130_s9, 4  ;;  %s58_s12 = sshll.u32 %s1131_s11, 4  ;;  %s45_s10 = int_to_ptr.vmem [resolvable:$true] %s44_s10  ;;  %s59_s12 = int_to_ptr.vmem [resolvable:$true] %s58_s12 }
  0x1a   :  { %s1066_s1 = scalar_lea.vmem %s45_s10, 512  ;;  %p1071_p11 = scmp.lt.s32.totalorder %s45_s10, %s45_s10 }
  0x1b   :  { %p1067_p10 = scmp.ne.s32.totalorder %s45_s10, %s1066_s1  ;;  %p1072_p12 = scmp.lt.s32.totalorder %s1066_s1, %s1066_s1 }
  0x1d   :  { %p1073_p13 = por %p1072_p12, %p1071_p11 }
  0x1f   :  { %p1074_p0 = pnand %p1073_p13, %p1067_p10 }
  0x21   :  { %1077 = shalt.err (!%p1074_p0)
}
  0x22   :  { %50 = dma.hbm_to_vmem [thread:$0]  %s1354_s2, 512, %s45_s10, [#allocation6], %s1128_s26, %s1128_s26, %s1129_s27  }
  0x23   :  { %s1086_s0 = scalar_lea.vmem %s59_s12, 2048  ;;  %p1091_p2 = scmp.lt.s32.totalorder %s59_s12, %s59_s12 }
  0x24   :  { %p1087_p1 = scmp.ne.s32.totalorder %s59_s12, %s1086_s0  ;;  %p1092_p3 = scmp.lt.s32.totalorder %s1086_s0, %s1086_s0 }
  0x26   :  { %p1093_p4 = por %p1092_p3, %p1091_p2 }
  0x28   :  { %p1094_p5 = pnand %p1093_p4, %p1087_p1 }
  0x2a   :  { %1097 = shalt.err (!%p1094_p5)
}
  0x2b   :  { %64 = dma.hbm_to_vmem [thread:$0]  %s1356_s4, 2048, %s59_s12, [#allocation9], %s1128_s26, %s1128_s26, %s1129_s27  }
  0x2c   :  { %1118 = dma.done.wait [#allocation3], 512  }
  0x2d   :  { %1119 = vsyncadd [#allocation3], 4294966784 }
  0x2e   :  { %1120 = dma.done.wait [#allocation6], 1024  }
  0x2f   :  { %1121 = vsyncadd [#allocation6], 4294966272 }
  0x30   :  { %1122 = dma.done.wait [#allocation9], 2048  }
  0x31   :  { %1123 = vsyncadd [#allocation9], 4294965248  ;;  %vm87_vm0 = vcmask 261120   ;;  %v1192_v0 = vld [vmem:[#allocation7 + $0x18] sm:$0xff]  ;;  %v1194_v1 = vld [vmem:[#allocation7 + $0x10] sm:$0xff]  ;;  %vm176_vm1 = vcmask 130048  }
  0x32   :  { %891 = vmatprep.subr.mxu1 %v1192_v0  ;;  %v81_v2 = vld [vmem:[#allocation5] sm:$0xff]  ;;  %v1198_v3 = vld [vmem:[#allocation7 + $0x8] sm:$0xff]  ;;  %v1214_v10 = vld [vmem:[#allocation8 + $0x78] sm:$0xff] }
  0x33   :  { %892 = vmatpush3.msra.mxu1 %v1192_v0  ;;  %899 = vmatprep.mubr.msk.f32.mxu1 %vm87_vm0, %v81_v2  ;;  %v1203_v4 = vld [vmem:[#allocation7] sm:$0xff]  ;;  %v82_v5 = vld [vmem:[#allocation5 + $0x8] sm:$0xff]  ;;  %v1216_v11 = vld [vmem:[#allocation8 + $0x70] sm:$0xff] }
  0x34   :  { %893 = vmatprep.subr.mxu1 %v1194_v1  ;;  %v79_v6 = vld [vmem:[#allocation2] sm:$0xff]  ;;  %v1212_v9 = vld [vmem:[#allocation2 + $0x8] sm:$0xff]  ;;  %v1230_v14 = vld [vmem:[#allocation8 + $0x58] sm:$0xff] }
  0x35   :  { %894 = vmatpush3.msra.mxu1 %v1194_v1  ;;  %948 = vmatprep.mubr.msk.f32.mxu0 %vm176_vm1, %v79_v6  ;;  %v1222_v12 = vld [vmem:[#allocation8 + $0x68] sm:$0xff]  ;;  %v1226_v13 = vld [vmem:[#allocation8 + $0x60] sm:$0xff]  ;;  %v1234_v15 = vld [vmem:[#allocation8 + $0x50] sm:$0xff] }
  0x36   :  { %895 = vmatprep.subr.mxu1 %v1198_v3  ;;  %v1238_v16 = vld [vmem:[#allocation8 + $0x48] sm:$0xff]  ;;  %v1242_v17 = vld [vmem:[#allocation8 + $0x40] sm:$0xff]  ;;  %v1246_v18 = vld [vmem:[#allocation8 + $0x38] sm:$0xff] }
  0x37   :  { %896 = vmatpush3.msra.mxu1 %v1198_v3  ;;  %v1250_v19 = vld [vmem:[#allocation8 + $0x30] sm:$0xff]  ;;  %v1254_v20 = vld [vmem:[#allocation8 + $0x28] sm:$0xff]  ;;  %v1258_v21 = vld [vmem:[#allocation8 + $0x20] sm:$0xff] }
  0x38   :  { %897 = vmatprep.subr.mxu1 %v1203_v4  ;;  %v1264_v22 = vld [vmem:[#allocation8 + $0x18] sm:$0xff]  ;;  %v1268_v23 = vld [vmem:[#allocation8 + $0x10] sm:$0xff]  ;;  %v1272_v24 = vld [vmem:[#allocation8 + $0x8] sm:$0xff] }
  0x39   :  { %898 = vmatpush3.msra.mxu1 %v1203_v4  ;;  %v1276_v25 = vld [vmem:[#allocation8] sm:$0xff]  ;;  %v439_v35 = vld [vmem:[#allocation5 + $0x10] sm:$0xff]  ;;  %v440_v36 = vld [vmem:[#allocation5 + $0x18] sm:$0xff] }
  0x3a   :  { %900 = vmatmul.mubr.msk.f32.vlgmr.msra.gmra.mxu1 %vm87_vm0, %v82_v5  ;;  %v1283_v26 = vld [vmem:[%s1355_s3] ss:$0 sm:$0xff]  ;;  %v436_v37 = vld [vmem:[#allocation2 + $0x10] sm:$0xff]  ;;  %v437_v45 = vld [vmem:[#allocation2 + $0x18] sm:$0xff] }
  0x3b   :  { %906 = vmatprep.mubr.msk.f32.mxu1 %vm176_vm1, %v79_v6  ;;  %v1304_v38 = vld [vmem:[%s1357_s5] ss:$0 sm:$0xff]  ;;  %s1132_s5 = smov [#allocation10]  }
  0x3c   :  { %s797_s18 = sshll.u32 %s1132_s5, 4  ;;  %s798_s18 = int_to_ptr.vmem [resolvable:$true] %s797_s18 }
  0x3d   :  { %s1098_s19 = scalar_lea.vmem %s798_s18, 512  ;;  %p1103_p7 = scmp.lt.s32.totalorder %s798_s18, %s798_s18 }
  0x3e   :  { %p1099_p6 = scmp.ne.s32.totalorder %s798_s18, %s1098_s19  ;;  %p1104_p8 = scmp.lt.s32.totalorder %s1098_s19, %s1098_s19 }
  0x40   :  { %p1105_p9 = por %p1104_p8, %p1103_p7 }
  0x42   :  { %p1106_p10 = pnand %p1105_p9, %p1099_p6 }
  0xfa   :  { %v901_v7 = vpop.f32.mrf.mxu1 }
  0xfb   :  { %902 = vmatprep.subr.mxu1 %v901_v7 }
  0xfc   :  { %v160_v8 = vpop.f32.mrf.mxu1  ;;  %903 = vmatpush3.msra.mxu1 %v901_v7 }
  0xfd   :  { %904 = vmatprep.subr.mxu1 %v160_v8 }
  0xfe   :  { %905 = vmatpush3.msra.mxu1 %v160_v8 }
  0xff   :  { %907 = vmatmul.mubr.msk.f32.vlgmr.msra.gmra.mxu1 %vm176_vm1, %v1212_v9  ;;  %909 = vmatprep.subr.mxu1 %v1214_v10 }
 0x100   :  { %910 = vmatpush3.msra.mxu1 %v1214_v10 }
 0x101   :  { %911 = vmatprep.subr.mxu1 %v1216_v11 }
 0x102   :  { %912 = vmatpush3.msra.mxu1 %v1216_v11 }
 0x103   :  { %913 = vmatprep.subr.mxu1 %v1222_v12 }
 0x104   :  { %914 = vmatpush3.msra.mxu1 %v1222_v12 }
 0x105   :  { %915 = vmatprep.subr.mxu1 %v1226_v13 }
 0x106   :  { %916 = vmatpush3.msra.mxu1 %v1226_v13 }
 0x107   :  { %917 = vmatprep.subr.mxu1 %v1230_v14 }
 0x108   :  { %918 = vmatpush3.msra.mxu1 %v1230_v14 }
 0x109   :  { %919 = vmatprep.subr.mxu1 %v1234_v15 }
 0x10a   :  { %920 = vmatpush3.msra.mxu1 %v1234_v15 }
 0x10b   :  { %921 = vmatprep.subr.mxu1 %v1238_v16 }
 0x10c   :  { %922 = vmatpush3.msra.mxu1 %v1238_v16 }
 0x10d   :  { %923 = vmatprep.subr.mxu1 %v1242_v17 }
 0x10e   :  { %924 = vmatpush3.msra.mxu1 %v1242_v17 }
 0x10f   :  { %925 = vmatprep.subr.mxu1 %v1246_v18 }
 0x110   :  { %926 = vmatpush3.msra.mxu1 %v1246_v18 }
 0x111   :  { %927 = vmatprep.subr.mxu1 %v1250_v19 }
 0x112   :  { %928 = vmatpush3.msra.mxu1 %v1250_v19 }
 0x113   :  { %929 = vmatprep.subr.mxu1 %v1254_v20 }
 0x114   :  { %930 = vmatpush3.msra.mxu1 %v1254_v20 }
 0x115   :  { %931 = vmatprep.subr.mxu1 %v1258_v21 }
 0x116   :  { %932 = vmatpush3.msra.mxu1 %v1258_v21 }
 0x117   :  { %933 = vmatprep.subr.mxu1 %v1264_v22 }
 0x118   :  { %934 = vmatpush3.msra.mxu1 %v1264_v22 }
 0x119   :  { %935 = vmatprep.subr.mxu1 %v1268_v23 }
 0x11a   :  { %936 = vmatpush3.msra.mxu1 %v1268_v23 }
 0x11b   :  { %937 = vmatprep.subr.mxu1 %v1272_v24 }
 0x11c   :  { %938 = vmatpush3.msra.mxu1 %v1272_v24 }
 0x11d   :  { %939 = vmatprep.subr.mxu1 %v1276_v25 }
 0x11e   :  { %940 = vmatpush3.msra.mxu1 %v1276_v25 }
 0x1bf   :  { %v908_v27 = vpop.f32.mrf.mxu1 }
 0x1c0   :  { %v255_v28 = vadd.f32 %v908_v27, %v1283_v26 }
 0x1c1   :  { %v249_v29 = vpop.f32.mrf.mxu1 }
 0x1c2   :  { %v250_v30 = vadd.f32 %v1283_v26, %v249_v29  ;;  %v259_v32 = vmax.f32 %v255_v28, 0.0 }
 0x1c4   :  { %v258_v31 = vmax.f32 %v250_v30, 0.0 }
 0x1c6   :  { %941 = vmatprep.mubr.f32.mxu1 %v258_v31 }
 0x1c7   :  { %942 = vmatmul.mubr.f32.vlgmr.msra.gmra.mxu1 %v259_v32 }
 0x1c8   :  { %1008 = vmatprep.mubr.msk.f32.mxu1 %vm176_vm1, %v436_v37 }
 0x287   :  { %v943_v33 = vpop.f32.mrf.mxu1 }
 0x288   :  { %944 = vmatprep.subr.mxu0 %v943_v33 }
 0x289   :  { %v342_v34 = vpop.f32.mrf.mxu1  ;;  %945 = vmatpush3.msra.mxu0 %v943_v33 }
 0x28a   :  { %946 = vmatprep.subr.mxu0 %v342_v34 }
 0x28b   :  { %947 = vmatpush3.msra.mxu0 %v342_v34 }
 0x28c   :  { %949 = vmatmul.mubr.msk.f32.vlgmr.msra.gmra.mxu0 %vm176_vm1, %v1212_v9  ;;  %951 = vmatprep.subr.mxu0 %v1192_v0 }
 0x28d   :  { %952 = vmatpush3.msra.mxu0 %v1192_v0  ;;  %959 = vmatprep.mubr.msk.f32.mxu0 %vm87_vm0, %v439_v35 }
 0x28e   :  { %953 = vmatprep.subr.mxu0 %v1194_v1 }
 0x28f   :  { %954 = vmatpush3.msra.mxu0 %v1194_v1 }
 0x290   :  { %955 = vmatprep.subr.mxu0 %v1198_v3 }
 0x291   :  { %956 = vmatpush3.msra.mxu0 %v1198_v3 }
 0x292   :  { %957 = vmatprep.subr.mxu0 %v1203_v4 }
 0x293   :  { %958 = vmatpush3.msra.mxu0 %v1203_v4 }
 0x294   :  { %960 = vmatmul.mubr.msk.f32.vlgmr.msra.gmra.mxu0 %vm87_vm0, %v440_v36 }
 0x295   :  { %966 = vmatprep.mubr.msk.f32.mxu0 %vm176_vm1, %v436_v37 }
 0x34c   :  { %v950_v39 = vpop.f32.mrf.mxu0 }
 0x34d   :  { %v430_v40 = vadd.f32 %v950_v39, %v1304_v38 }
 0x34e   :  { %v424_v41 = vpop.f32.mrf.mxu0 }
 0x34f   :  { %434 = vst [vmem:[#allocation10 + $0x8] sm:$0xff] %v430_v40  ;;  %v425_v42 = vadd.f32 %v1304_v38, %v424_v41 }
 0x351   :  { %433 = vst [vmem:[#allocation10] sm:$0xff] %v425_v42 }
 0x354   :  { %v961_v43 = vpop.f32.mrf.mxu0 }
 0x355   :  { %962 = vmatprep.subr.mxu0 %v961_v43 }
 0x356   :  { %v517_v44 = vpop.f32.mrf.mxu0  ;;  %963 = vmatpush3.msra.mxu0 %v961_v43 }
 0x357   :  { %964 = vmatprep.subr.mxu0 %v517_v44 }
 0x358   :  { %965 = vmatpush3.msra.mxu0 %v517_v44 }
 0x359   :  { %967 = vmatmul.mubr.msk.f32.vlgmr.msra.gmra.mxu0 %vm176_vm1, %v437_v45  ;;  %969 = vmatprep.subr.mxu0 %v1214_v10 }
 0x35a   :  { %970 = vmatpush3.msra.mxu0 %v1214_v10 }
 0x35b   :  { %971 = vmatprep.subr.mxu0 %v1216_v11 }
 0x35c   :  { %972 = vmatpush3.msra.mxu0 %v1216_v11 }
 0x35d   :  { %973 = vmatprep.subr.mxu0 %v1222_v12 }
 0x35e   :  { %974 = vmatpush3.msra.mxu0 %v1222_v12 }
 0x35f   :  { %975 = vmatprep.subr.mxu0 %v1226_v13 }
 0x360   :  { %976 = vmatpush3.msra.mxu0 %v1226_v13 }
 0x361   :  { %977 = vmatprep.subr.mxu0 %v1230_v14 }
 0x362   :  { %978 = vmatpush3.msra.mxu0 %v1230_v14 }
 0x363   :  { %979 = vmatprep.subr.mxu0 %v1234_v15 }
 0x364   :  { %980 = vmatpush3.msra.mxu0 %v1234_v15 }
 0x365   :  { %981 = vmatprep.subr.mxu0 %v1238_v16 }
 0x366   :  { %982 = vmatpush3.msra.mxu0 %v1238_v16 }
 0x367   :  { %983 = vmatprep.subr.mxu0 %v1242_v17 }
 0x368   :  { %984 = vmatpush3.msra.mxu0 %v1242_v17 }
 0x369   :  { %985 = vmatprep.subr.mxu0 %v1246_v18 }
 0x36a   :  { %986 = vmatpush3.msra.mxu0 %v1246_v18 }
 0x36b   :  { %987 = vmatprep.subr.mxu0 %v1250_v19 }
 0x36c   :  { %988 = vmatpush3.msra.mxu0 %v1250_v19 }
 0x36d   :  { %989 = vmatprep.subr.mxu0 %v1254_v20 }
 0x36e   :  { %990 = vmatpush3.msra.mxu0 %v1254_v20 }
 0x36f   :  { %991 = vmatprep.subr.mxu0 %v1258_v21 }
 0x370   :  { %992 = vmatpush3.msra.mxu0 %v1258_v21 }
 0x371   :  { %993 = vmatprep.subr.mxu0 %v1264_v22 }
 0x372   :  { %994 = vmatpush3.msra.mxu0 %v1264_v22 }
 0x373   :  { %995 = vmatprep.subr.mxu0 %v1268_v23 }
 0x374   :  { %996 = vmatpush3.msra.mxu0 %v1268_v23 }
 0x375   :  { %997 = vmatprep.subr.mxu0 %v1272_v24 }
 0x376   :  { %998 = vmatpush3.msra.mxu0 %v1272_v24 }
 0x377   :  { %999 = vmatprep.subr.mxu0 %v1276_v25 }
 0x378   :  { %1000 = vmatpush3.msra.mxu0 %v1276_v25 }
 0x419   :  { %v968_v46 = vpop.f32.mrf.mxu0 }
 0x41a   :  { %v611_v47 = vadd.f32 %v968_v46, %v1283_v26 }
 0x41b   :  { %v605_v48 = vpop.f32.mrf.mxu0 }
 0x41c   :  { %v606_v49 = vadd.f32 %v1283_v26, %v605_v48  ;;  %v615_v51 = vmax.f32 %v611_v47, 0.0 }
 0x41e   :  { %v614_v50 = vmax.f32 %v606_v49, 0.0 }
 0x420   :  { %1001 = vmatprep.mubr.f32.mxu0 %v614_v50 }
 0x421   :  { %1002 = vmatmul.mubr.f32.vlgmr.msra.gmra.mxu0 %v615_v51 }
 0x4e1   :  { %v1003_v52 = vpop.f32.mrf.mxu0 }
 0x4e2   :  { %1004 = vmatprep.subr.mxu1 %v1003_v52 }
 0x4e3   :  { %v698_v53 = vpop.f32.mrf.mxu0  ;;  %1005 = vmatpush3.msra.mxu1 %v1003_v52 }
 0x4e4   :  { %1006 = vmatprep.subr.mxu1 %v698_v53 }
 0x4e5   :  { %1007 = vmatpush3.msra.mxu1 %v698_v53 }
 0x4e6   :  { %1009 = vmatmul.mubr.msk.f32.vlgmr.msra.gmra.mxu1 %vm176_vm1, %v437_v45 }
 0x5a6   :  { %v1010_v54 = vpop.f32.mrf.mxu1 }
 0x5a7   :  { %v786_v55 = vadd.f32 %v1010_v54, %v1304_v38 }
 0x5a8   :  { %v780_v56 = vpop.f32.mrf.mxu1 }
 0x5a9   :  { %791 = vst [vmem:[#allocation10 + $0x18] sm:$0xff] %v786_v55  ;;  %v781_v57 = vadd.f32 %v1304_v38, %v780_v56 }
 0x5ab   :  { %790 = vst [vmem:[#allocation10 + $0x10] sm:$0xff] %v781_v57 }
 0x5ac   :  { %1109 = shalt.err (!%p1106_p10)
}
 0x5ad   :  { %803 = dma.vmem_to_hbm [thread:$0]  %s798_s18, 512, %s1358_s6, [#allocation4], %s1128_s26, %s1128_s26, %s1129_s27  }
 0x5ae   :  { %1124 = dma.done.wait [#allocation4], 512  }
 0x5af   :  { %1125 = vsyncadd [#allocation4], 4294966784 }
 0x5b0   :  { %807 = vsyncpa [#allocation3], 1 }
 0x5b1   :  { %808 = vsyncpa [#allocation6], 1 }
 0x5b2   :  { %809 = vsyncpa [#allocation9], 1 }
 0x5b3   :  { %810 = vsyncpa [#allocation4], 1 }

</bundles_post_ra>
